<compile_context>
chip_gen: v6e
topology: v6e:2x2x1
jax: 0.10.0
libtpu: 0.0.40
codegen_flags: <defaults>
</compile_context>

<pallas_src>
import functools
import math

import jax
import jax.numpy as jnp
from jax.experimental import pallas as pl
from jax.experimental.pallas import tpu as pltpu


_SMEM = pl.BlockSpec(memory_space=pltpu.MemorySpace.SMEM)
_COST = pl.CostEstimate(flops=0, transcendentals=0, bytes_accessed=40)

# reason codes: 0 = no stop, 1 = nan, 2 = patience, 3 = val/train ratio.
# Note stop == (reason != 0), so only the reason code is materialized.


def _checkval_kernel(loss_ref, istate_ref, best_ref,
                     istate_out_ref, best_out_ref,
                     *, patience, valtrain_ratio):
    """All refs are tiny SMEM arrays; every op is a scalar op.

    loss_ref:   (2,) float32 -> [lossi (val), lossj (train)]
    istate_ref: (4,) int32   -> [i, has_best, steps_since, prev_reason]
    best_ref:   (1,) float32 -> best_loss
    istate_out_ref / best_out_ref: aliased onto istate_ref / best_ref.
    """
    li = loss_ref[0]          # validation loss
    lj = loss_ref[1]          # training loss
    i = istate_ref[0]         # device-resident step counter
    has_best = istate_ref[1]  # 0 == "best_loss is None"
    steps = istate_ref[2]
    best = best_ref[0]

    # np.isnan(lossi) or np.isnan(lossj)   (NaN path does not touch the state)
    is_nan = jnp.logical_or(li != li, lj != lj)

    # "if i == 0 or self.best_loss is None"
    init = jnp.logical_or(i == 0, has_best == 0)
    improved = li < best

    best_else = jnp.where(improved, li, best)
    steps_else = jnp.where(improved, jnp.int32(0), steps + 1)

    new_best = jnp.where(init, li, best_else)
    new_steps = jnp.where(init, jnp.int32(0), steps_else)

    not_init = jnp.logical_not(init)
    patience_hit = jnp.logical_and(not_init, new_steps == patience)

    # (lj / li) <= valtrain_ratio without scalar fp division (sign-aware
    # multiply rewrite; ~1 ulp from the division at the exact boundary,
    # li == -0.0 falls into the li == 0 branch):
    #   li > 0:  lj <= r * li
    #   li < 0:  lj >= r * li
    #   li == 0: lj/li is +-inf/nan -> test holds iff lj < 0
    ratio_cmp = jnp.where(
        li > 0.0, lj <= valtrain_ratio * li,
        jnp.where(li < 0.0, lj >= valtrain_ratio * li, lj < 0.0))
    ratio_hit = jnp.logical_and(
        not_init,
        jnp.logical_and(jnp.logical_not(patience_hit), ratio_cmp))

    reason_cv = jnp.where(
        patience_hit, jnp.int32(2),
        jnp.where(ratio_hit, jnp.int32(3), jnp.int32(0)))
    reason = jnp.where(is_nan, jnp.int32(1), reason_cv)

    istate_out_ref[0] = i + 1                                   # step counter
    istate_out_ref[1] = jnp.where(is_nan, has_best, jnp.int32(1))
    istate_out_ref[2] = jnp.where(is_nan, steps, new_steps)
    istate_out_ref[3] = reason
    best_out_ref[0] = jnp.where(is_nan, best, new_best)


def _nan_kernel(loss_ref, reason_ref):
    """checkval=False variant: NaN check only, stateless."""
    li = loss_ref[0]
    lj = loss_ref[1]
    is_nan = jnp.logical_or(li != li, lj != lj)
    reason_ref[0] = is_nan.astype(jnp.int32)


def make_checkval_call(patience, valtrain_ratio):
    kernel = functools.partial(
        _checkval_kernel,
        patience=int(patience),
        valtrain_ratio=float(valtrain_ratio),
    )
    call = pl.pallas_call(
        kernel,
        out_shape=(
            jax.ShapeDtypeStruct((4,), jnp.int32),    # [i, has_best, steps, reason]
            jax.ShapeDtypeStruct((1,), jnp.float32),  # best_loss
        ),
        in_specs=[_SMEM, _SMEM, _SMEM],
        out_specs=(_SMEM, _SMEM),
        # Persistent state is updated strictly in place.
        input_output_aliases={1: 0, 2: 1},
        cost_estimate=_COST,
    )

    def run(lossi, lossj, int_state, best_state):
        # Packing fused into the jit: device-array losses never touch the host.
        losses = jnp.stack([jnp.asarray(lossi, jnp.float32).reshape(()),
                            jnp.asarray(lossj, jnp.float32).reshape(())])
        return call(losses, int_state, best_state)

    return jax.jit(run, donate_argnums=(2, 3))


def make_nan_call():
    call = pl.pallas_call(
        _nan_kernel,
        out_shape=jax.ShapeDtypeStruct((1,), jnp.int32),
        in_specs=[_SMEM],
        out_specs=_SMEM,
        cost_estimate=_COST,
    )

    def run(lossi, lossj):
        losses = jnp.stack([jnp.asarray(lossi, jnp.float32).reshape(()),
                            jnp.asarray(lossj, jnp.float32).reshape(())])
        return call(losses)

    return jax.jit(run)


class StopCriterion:
    """JAX/Pallas port of drg_tools.model_training.stop_criterion.

    defer_readback=True returns the *previous* step's decision (one-step
    delay) so the tiny flag readback overlaps the next train step instead of
    stalling the pipeline; default False preserves exact reference semantics.
    """

    def __init__(self, checkval, patience, valtrain_ratio=0.2,
                 defer_readback=False):
        if valtrain_ratio is None:
            valtrain_ratio = 0.0
        self.checkval = bool(checkval)
        self.patience = int(patience)
        self.valtrain_ratio = float(valtrain_ratio)
        self.defer_readback = bool(defer_readback)
        if self.checkval:
            self._call = make_checkval_call(self.patience, self.valtrain_ratio)
        else:
            self._call = make_nan_call()
        self.reset()

    def reset(self):
        """Re-initialise the device-resident state (== `i == 0` in the reference)."""
        self.int_state = jnp.zeros((4,), jnp.int32)      # [i, has_best, steps_since, reason]
        self.best_state = jnp.zeros((1,), jnp.float32)   # [best_loss]
        self._pending = None

    def __call__(self, i, lossi, lossj):
        # `i == 0` re-initialisation semantics of the reference. If `i`
        # arrives as a device array we avoid a blocking read and rely on the
        # in-kernel step counter (call reset() explicitly when restarting).
        if not isinstance(i, jax.Array) and int(i) == 0:
            self.reset()

        # Deferred mode: resolve last step's decision *before* launching (its
        # state buffer is donated to the new launch); the async D2H issued
        # last step has normally finished by now, so this does not stall.
        prev = None
        if self.defer_readback and self._pending is not None:
            prev = self._resolve(*self._pending)
            self._pending = None

        if self.checkval:
            new_int, new_best = self._call(lossi, lossj,
                                           self.int_state, self.best_state)
            self.int_state, self.best_state = new_int, new_best
            flags, idx = new_int, 3
        else:
            flags, idx = self._call(lossi, lossj), 0

        # Start the tiny (<=16 B) flag readback asynchronously.
        if hasattr(flags, "copy_to_host_async"):
            flags.copy_to_host_async()

        if self.defer_readback:
            self._pending = (flags, idx, lossi, lossj)
            return prev if prev is not None else (False, None)
        return self._resolve(flags, idx, lossi, lossj)

    def flush(self):
        """Deferred mode: resolve the not-yet-reported last decision."""
        if self._pending is None:
            return (False, None)
        prev = self._resolve(*self._pending)
        self._pending = None
        return prev

    def _resolve(self, flags, idx, lossi, lossj):
        reason = int(jax.device_get(flags)[idx])
        if reason == 0:
            return False, None
        if reason == 1:
            return True, 'Loss nan'
        if reason == 2:
            return True, ('Loss has not decreased since ' +
                          str(self.patience) + ' steps')
        # reason == 3: ratio criterion; format ratio host-side like the ref.
        return True, ('Loss has not decreased since ' + str(self.patience) +
                      ' steps and trainloss/valloss is ' +
                      str(round(float(lossj) / float(lossi), 2)))


class _RefStopCriterion:
    """Pure-Python mirror of the original PyTorch module (ground truth)."""

    def __init__(self, checkval, patience, valtrain_ratio=0.2):
        self.best_loss = None
        self.steps_since = 0
        self.checkval = checkval
        self.patience = patience
        self.valtrain_ratio = 0 if valtrain_ratio is None else valtrain_ratio

    def __call__(self, i, lossi, lossj):
        if math.isnan(lossi) or math.isnan(lossj):
            return (True, 'Loss nan')
        if self.checkval:
            if i == 0 or self.best_loss is None:
                self.best_loss = lossi
                self.steps_since = 0
            else:
                if lossi < self.best_loss:
                    self.best_loss = lossi
                    self.steps_since = 0
                else:
                    self.steps_since += 1
                if self.steps_since == self.patience:
                    return (True, 'Loss has not decreased since ' +
                            str(self.patience) + ' steps')
                elif lossj / lossi <= self.valtrain_ratio:
                    return (True, 'Loss has not decreased since ' +
                            str(self.patience) + ' steps and trainloss/valloss is ' +
                            str(round(lossj / lossi, 2)))
        return (False, None)


if __name__ == "__main__":
    key = jax.random.PRNGKey(0)
    n_steps = 8  # seq=8 synthetic loss curves
    vk, tk = jax.random.split(key)
    val_noise = jax.random.uniform(vk, (n_steps,), jnp.float32, 0.0, 0.004)
    train_noise = jax.random.uniform(tk, (n_steps,), jnp.float32, 0.0, 0.004)
    # Losses plateau after step 2 so the patience criterion fires.
    base = jnp.array([1.0, 0.8, 0.7, 0.71, 0.72, 0.73, 0.74, 0.75], jnp.float32)
    val_losses = [float(x) for x in (base + val_noise)]
    train_losses = [float(x) for x in (0.9 * base + train_noise)]

    # --- patience path (checked against the Python reference) -----------------
    crit = StopCriterion(checkval=True, patience=3, valtrain_ratio=0.2)
    ref = _RefStopCriterion(checkval=True, patience=3, valtrain_ratio=0.2)
    stopped = False
    for step in range(n_steps):
        li, lj = val_losses[step], train_losses[step]
        stop, msg = crit(step, li, lj)
        stop_r, msg_r = ref(step, li, lj)
        assert stop == stop_r and msg == msg_r, (step, stop, msg, stop_r, msg_r)
        if stop:
            stopped = True
            break
    assert stopped  # patience=3 with plateauing losses must trigger a stop

    # --- val/train ratio path --------------------------------------------------
    crit2 = StopCriterion(checkval=True, patience=5, valtrain_ratio=0.2)
    ref2 = _RefStopCriterion(checkval=True, patience=5, valtrain_ratio=0.2)
    for step, li, lj in [(0, 1.0, 0.9), (1, 1.01, 0.1)]:
        stop, msg = crit2(step, li, lj)
        stop_r, msg_r = ref2(step, li, lj)
        assert stop == stop_r and msg == msg_r, (step, stop, msg, stop_r, msg_r)
    assert stop  # ratio criterion fired on step 1

    # --- nan path --------------------------------------------------------------
    crit3 = StopCriterion(checkval=True, patience=3, valtrain_ratio=0.2)
    stop_nan, msg_nan = crit3(0, float("nan"), 1.0)
    assert stop_nan and msg_nan == 'Loss nan'

    # --- checkval=False path ----------------------------------------------------
    crit4 = StopCriterion(checkval=False, patience=3, valtrain_ratio=0.2)
    for step in range(3):
        stop, msg = crit4(step, val_losses[step], train_losses[step])
        assert (not stop) and msg is None

    # --- device-array losses (no host round-trip per step) ---------------------
    crit5 = StopCriterion(checkval=True, patience=3, valtrain_ratio=0.2)
    ref5 = _RefStopCriterion(checkval=True, patience=3, valtrain_ratio=0.2)
    dev_val = jnp.asarray(val_losses, jnp.float32)
    dev_train = jnp.asarray(train_losses, jnp.float32)
    for step in range(n_steps):
        stop, msg = crit5(step, dev_val[step], dev_train[step])
        stop_r, msg_r = ref5(step, float(dev_val[step]), float(dev_train[step]))
        assert stop == stop_r and msg == msg_r, (step, stop, msg, stop_r, msg_r)
        if stop:
            break

    # --- deferred (one-step-delayed) readback mode ------------------------------
    ref_d = _RefStopCriterion(checkval=True, patience=3, valtrain_ratio=0.2)
    ref_decisions = [ref_d(s, val_losses[s], train_losses[s]) for s in range(n_steps)]
    crit_d = StopCriterion(checkval=True, patience=3, valtrain_ratio=0.2,
                           defer_readback=True)
    got = [crit_d(s, val_losses[s], train_losses[s]) for s in range(n_steps)]
    assert got[0] == (False, None)
    for s in range(1, n_steps):
        assert got[s] == ref_decisions[s - 1], (s, got[s], ref_decisions[s - 1])
    assert any(g[0] for g in got)   # deferred mode still eventually stops

    jax.block_until_ready((crit.best_state, crit.int_state,
                           crit5.best_state, crit_d.int_state))
    print("KERNEL_OK")
</pallas_src>

<mosaic_0001>
module attributes {stable_mosaic.version = 11 : i64} {
  func.func @_checkval_kernel(%arg0: memref<2xf32, #tpu.memory_space<smem>>, %arg1: memref<4xi32, #tpu.memory_space<smem>>, %arg2: memref<1xf32, #tpu.memory_space<smem>>, %arg3: memref<4xi32, #tpu.memory_space<smem>>, %arg4: memref<1xf32, #tpu.memory_space<smem>>) attributes {dimension_semantics = [], scalar_prefetch = 0 : i64, scratch_operands = 0 : i64, tpu.core_type = #tpu.core_type<tc>} {
    %c0 = arith.constant 0 : index
    %0 = memref.load %arg0[%c0] : memref<2xf32, #tpu.memory_space<smem>>
    %c1 = arith.constant 1 : index
    %1 = memref.load %arg0[%c1] : memref<2xf32, #tpu.memory_space<smem>>
    %c0_0 = arith.constant 0 : index
    %2 = memref.load %arg1[%c0_0] : memref<4xi32, #tpu.memory_space<smem>>
    %c1_1 = arith.constant 1 : index
    %3 = memref.load %arg1[%c1_1] : memref<4xi32, #tpu.memory_space<smem>>
    %c2 = arith.constant 2 : index
    %4 = memref.load %arg1[%c2] : memref<4xi32, #tpu.memory_space<smem>>
    %c0_2 = arith.constant 0 : index
    %5 = memref.load %arg2[%c0_2] : memref<1xf32, #tpu.memory_space<smem>>
    %6 = arith.cmpf one, %0, %0 : f32
    %7 = arith.cmpf one, %1, %1 : f32
    %8 = arith.ori %6, %7 : i1
    %c0_i32 = arith.constant 0 : i32
    %9 = arith.cmpi eq, %2, %c0_i32 : i32
    %c0_i32_3 = arith.constant 0 : i32
    %10 = arith.cmpi eq, %3, %c0_i32_3 : i32
    %11 = arith.ori %9, %10 : i1
    %12 = arith.cmpf olt, %0, %5 : f32
    %13 = arith.select %12, %0, %5 : f32
    %c1_i32 = arith.constant 1 : i32
    %14 = arith.addi %4, %c1_i32 : i32
    %c0_i32_4 = arith.constant 0 : i32
    %15 = arith.select %12, %c0_i32_4, %14 : i32
    %16 = arith.select %11, %0, %13 : f32
    %c0_i32_5 = arith.constant 0 : i32
    %17 = arith.select %11, %c0_i32_5, %15 : i32
    %true = arith.constant true
    %18 = arith.xori %11, %true : i1
    %c3_i32 = arith.constant 3 : i32
    %19 = arith.cmpi eq, %17, %c3_i32 : i32
    %20 = arith.andi %18, %19 : i1
    %cst = arith.constant 0.000000e+00 : f32
    %21 = arith.cmpf ogt, %0, %cst : f32
    %cst_6 = arith.constant 2.000000e-01 : f32
    %22 = arith.mulf %cst_6, %0 : f32
    %23 = arith.cmpf ole, %1, %22 : f32
    %cst_7 = arith.constant 0.000000e+00 : f32
    %24 = arith.cmpf olt, %0, %cst_7 : f32
    %cst_8 = arith.constant 2.000000e-01 : f32
    %25 = arith.mulf %cst_8, %0 : f32
    %26 = arith.cmpf oge, %1, %25 : f32
    %cst_9 = arith.constant 0.000000e+00 : f32
    %27 = arith.cmpf olt, %1, %cst_9 : f32
    %28 = arith.select %24, %26, %27 : i1
    %29 = arith.select %21, %23, %28 : i1
    %true_10 = arith.constant true
    %30 = arith.xori %20, %true_10 : i1
    %31 = arith.andi %30, %29 : i1
    %32 = arith.andi %18, %31 : i1
    %c3_i32_11 = arith.constant 3 : i32
    %c0_i32_12 = arith.constant 0 : i32
    %33 = arith.select %32, %c3_i32_11, %c0_i32_12 : i32
    %c2_i32 = arith.constant 2 : i32
    %34 = arith.select %20, %c2_i32, %33 : i32
    %c1_i32_13 = arith.constant 1 : i32
    %35 = arith.select %8, %c1_i32_13, %34 : i32
    %c1_i32_14 = arith.constant 1 : i32
    %36 = arith.addi %2, %c1_i32_14 : i32
    %c0_15 = arith.constant 0 : index
    %37 = memref.load %arg3[%c0_15] : memref<4xi32, #tpu.memory_space<smem>>
    memref.store %36, %arg3[%c0_15] : memref<4xi32, #tpu.memory_space<smem>>
    %c1_i32_16 = arith.constant 1 : i32
    %38 = arith.select %8, %3, %c1_i32_16 : i32
    %c1_17 = arith.constant 1 : index
    %39 = memref.load %arg3[%c1_17] : memref<4xi32, #tpu.memory_space<smem>>
    memref.store %38, %arg3[%c1_17] : memref<4xi32, #tpu.memory_space<smem>>
    %40 = arith.select %8, %4, %17 : i32
    %c2_18 = arith.constant 2 : index
    %41 = memref.load %arg3[%c2_18] : memref<4xi32, #tpu.memory_space<smem>>
    memref.store %40, %arg3[%c2_18] : memref<4xi32, #tpu.memory_space<smem>>
    %c3 = arith.constant 3 : index
    %42 = memref.load %arg3[%c3] : memref<4xi32, #tpu.memory_space<smem>>
    memref.store %35, %arg3[%c3] : memref<4xi32, #tpu.memory_space<smem>>
    %43 = arith.select %8, %5, %16 : f32
    %c0_19 = arith.constant 0 : index
    %44 = memref.load %arg4[%c0_19] : memref<1xf32, #tpu.memory_space<smem>>
    memref.store %43, %arg4[%c0_19] : memref<1xf32, #tpu.memory_space<smem>>
    return
  }
}

</mosaic_0001>

<bundles_post_ra>
// kernel: run.1
= control target key start
LH: loop header
LB: loop body
LE: loop exit
PB: predicated region body
PF: predicated region fallthrough
CT: control target
= control target key end

     0   :  { %11 = vsyncpa [#allocation6], 0  ;;  %s300_s0 = inlined_call_operand.vmem [shape: f32[2], index: 0, kind: input, shape index: {}]   ;;  %s301_s1 = inlined_call_operand.hbm [shape: s32[4], index: 1, kind: input, shape index: {}, may-alias: {1,3}]   ;;  %s302_s2 = inlined_call_operand.<no memory space> [shape: f32[1], index: 2, kind: input, shape index: {}, may-alias: {2,4}]   ;;  %s303_s3 = inlined_call_operand.hbm [shape: s32[4], index: 3, kind: output, shape index: {0}, may-alias: {1,3}]   ;;  %s304_s4 = inlined_call_operand.hbm [shape: f32[1], index: 4, kind: output, shape index: {1}, may-alias: {2,4}]  }
   0x1   :  { %12 = vsyncpa [#allocation4], 0 }
   0x2   :  { %13 = vsyncpa [#allocation5], 0 }
   0x3   :  { %14 = vsyncpa [#allocation10], 0  ;;  %s21_s17 = sshll.u32 %s300_s0, 4  ;;  %s22_s17 = int_to_ptr.vmem [resolvable:$true] %s21_s17 }
   0x4   :  { %s136_s18 = scalar_lea.vmem %s22_s17, 16  ;;  %p141_p1 = scmp.lt.s32.totalorder %s22_s17, %s22_s17 }
   0x5   :  { %p137_p0 = scmp.ne.s32.totalorder %s22_s17, %s136_s18  ;;  %p142_p2 = scmp.lt.s32.totalorder %s136_s18, %s136_s18 }
   0x7   :  { %p143_p3 = por %p142_p2, %p141_p1 }
   0x9   :  { %p144_p4 = pnand %p143_p3, %p137_p0 }
   0xb   :  { %147 = shalt.err (!%p144_p4)
}
   0xc   :  { %s180_s19 = smov [#allocation3]   ;;  %s181_s20 = smov [#allocation7]  }
   0xd   :  { %24 = dma.vmem_to_smem %s22_s17, 16, %s180_s19, [#allocation6]  }
   0xe   :  { %32 = dma.hbm_to_smem %s301_s1, 16, %s181_s20, [#allocation4]  }
   0xf   :  { %172 = dma.done.wait [#allocation6], 16  }
  0x10   :  { %173 = vsyncadd [#allocation6], 4294967280 }
  0x11   :  { %174 = dma.done.wait [#allocation4], 16  }
  0x12   :  { %175 = vsyncadd [#allocation4], 4294967280 }
  0x13   :  { %41 = sfence }
  0x14   :  { %s215_s0 = sld [smem:[#allocation3]] }
  0x15   :  { %s127_s23 = sld [smem:[#allocation3 + $0x1]] }
  0x16   :  { %s44_s24 = sld [smem:[#allocation7]] }
  0x17   :  { %s217_s25 = sld [smem:[#allocation7 + $0x1]] }
  0x18   :  { %s219_s26 = sld [smem:[#allocation7 + $0x2]] }
  0x1a   :  { %p48_p5 = scmp.ne.f32.partialorder %s215_s0, %s215_s0  ;;  %p54_p8 = scmp.lt.f32.partialorder %s215_s0, %s302_s2 }
  0x1b   :  { %p49_p6 = scmp.ne.f32.partialorder %s127_s23, %s127_s23  ;;  %s65_s28 = smul.f32 0.2, %s215_s0 }
  0x1c   :  { %p51_p7 = scmp.eq.s32.totalorder %s44_s24, 0  ;;  %p69_p0 = scmp.lt.f32.partialorder %s127_s23, 0.0 }
  0x1d   :  { %p52_p9 = scmp.eq.s32.totalorder %s217_s25, 0  ;;  %p230_p10 = por %p49_p6, %p48_p5 }
  0x1e   :  { %s56_s29 = sadd.s32 1, %s219_s26  ;;  %p243_p12 = scmp.le.f32.partialorder %s127_s23, %s65_s28 }
  0x1f   :  { %p234_p11 = por %p52_p9, %p51_p7  ;;  %s310_s29 = smov (%p54_p8, %s56_s29), 0 }
  0x20   :  { %p68_p13 = scmp.ge.f32.partialorder %s127_s23, %s65_s28  ;;  %s86_s9 = sadd.s32 1, %s44_s24 }
  0x21   :  { %s312_s29 = smov (%p234_p11, %s310_s29), 0  ;;  %p67_p1 = scmp.lt.f32.partialorder %s215_s0, 0.0 }
  0x22   :  { %88 = sst [smem:[#allocation8]] %s86_s9  ;;  %p60_p2 = pneg %p234_p11 }
  0x23   :  { %s70_s10 = scalar_select %p68_p13, 1, 0 }
  0x24   :  { %p61_p3 = scmp.eq.s32.totalorder %s312_s29, 3  ;;  %s316_s25 = smov (!%p230_p10, %s217_s25), 1 }
  0x25   :  { %s71_s11 = scalar_select %p69_p0, 1, 0 }
  0x26   :  { %s74_s12 = scalar_select %p243_p12, 1, 0 }
  0x27   :  { %s314_s10 = smov (!%p67_p1, %s70_s10), %s71_s11  ;;  %p64_p4 = scmp.gt.f32.partialorder %s215_s0, 0.0 }
  0x28   :  { %p73_p5 = scmp.eq.s32.totalorder %s314_s10, 1  ;;  %p261_p6 = pnand %p61_p3, %p60_p2 }
  0x29   :  { %91 = sst [smem:[#allocation8 + $0x1]] %s316_s25  ;;  %s318_s26 = smov (!%p230_p10, %s219_s26), %s312_s29 }
  0x2a   :  { %s75_s14 = scalar_select %p73_p5, 1, 0 }
  0x2b   :  { %94 = sst [smem:[#allocation8 + $0x2]] %s318_s26  ;;  %s182_s23 = smov [#allocation9]  }
  0x2c   :  { %s320_s12 = smov (!%p64_p4, %s74_s12), %s75_s14  ;;  %s183_s26 = smov [#allocation8]  }
  0x2d   :  { %p77_p7 = scmp.eq.s32.totalorder %s320_s12, 1 }
  0x2e   :  { %s55_s19 = scalar_select %p54_p8, %s215_s0, %s302_s2 }
  0x2f   :  { %p79_p9 = pnand %p77_p7, %p261_p6 }
  0x30   :  { %s322_s0 = smov (!%p234_p11, %s215_s0), %s55_s19 }
  0x31   :  { %p80_p12 = pneg %p79_p9  ;;  %s324_s2 = smov (!%p230_p10, %s302_s2), %s322_s0 }
  0x32   :  { %99 = sst [smem:[#allocation9]] %s324_s2 }
  0x33   :  { %p81_p13 = pnand %p80_p12, %p60_p2 }
  0x34   :  { %115 = dma.smem_to_hbm %s182_s23, 16, %s304_s4, [#allocation10]  }
  0x35   :  { %s130_s22 = scalar_select %p81_p13, 0, 3 }
  0x37   :  { %s326_s22 = smov (!%p261_p6, %s130_s22), 2 }
  0x38   :  { %s328_s22 = smov (%p230_p10, %s326_s22), 1 }
  0x39   :  { %96 = sst [smem:[#allocation8 + $0x3]] %s328_s22 }
  0x3a   :  { %107 = dma.smem_to_hbm %s183_s26, 16, %s303_s3, [#allocation5]  }
  0x3b   :  { %176 = dma.done.wait [#allocation5], 16  }
  0x3c   :  { %177 = vsyncadd [#allocation5], 4294967280 }
  0x3d   :  { %178 = dma.done.wait [#allocation10], 16  }
  0x3e   :  { %179 = vsyncadd [#allocation10], 4294967280 }
  0x3f   :  { %122 = sfence }
  0x40   :  { %123 = vsyncpa [#allocation4], 1 }
  0x41   :  { %124 = vsyncpa [#allocation5], 1 }
  0x42   :  { %125 = vsyncpa [#allocation10], 1 }
  0x43   :  { %126 = vsyncpa [#allocation6], 1 }

</bundles_post_ra>
